<compile_context>
chip_gen: v6e
topology: v6e:2x2x1
jax: 0.10.0
libtpu: 0.0.40
codegen_flags: <defaults>
</compile_context>

<pallas_src>
import jax
import jax.numpy as jnp
from jax.experimental import pallas as pl
from jax.experimental.pallas import tpu as pltpu

IN_FEATURES = 28 * 28      # 784 (== full array dim, so a non-128-multiple block is legal)
HIDDEN = 128
OUT_FEATURES = 10
N_PAD = 128                # lane-dense output width (zero-padded logit columns 10..127)
MAX_TILE_B = 2048          # ~20 MiB working set double-buffered; fits everywhere


def _round_up(x, m):
    return -(-x // m) * m


def _choose_tile_b(batch):
    # Multiple of 16 (bf16 sublane packing); >= 2 grid steps once batch > 16 so
    # the "parallel" batch axis actually shards across v7x's two TensorCores.
    half = _round_up(max(1, -(-batch // 2)), 16)
    return max(16, min(MAX_TILE_B, half))


def _mlp_kernel(x_ref, w1_ref, b1_ref, w2_ref, b2_ref, o_ref):
    # x_ref : [TILE_B, 784] f32   (cast to bf16 here; VPU slack makes it free)
    # w1_ref: [784, 128]    bf16
    # b1_ref: [1, 128]      f32
    # w2_ref: [128, 128]    bf16  (zero-padded cols 10..127)
    # b2_ref: [1, 128]      f32   (zero-padded cols 10..127)
    # o_ref : [TILE_B, 128] bf16  (lane-dense unmasked vst)
    x = x_ref[...].astype(jnp.bfloat16)
    h = jnp.dot(x, w1_ref[...], preferred_element_type=jnp.float32)
    h = jnp.maximum(h + b1_ref[...], 0.0)                       # f32 bias + ReLU epilogue
    out = jnp.dot(h.astype(jnp.bfloat16), w2_ref[...],
                  preferred_element_type=jnp.float32)
    o_ref[...] = (out + b2_ref[...]).astype(o_ref.dtype)


def prepare_params(w1, b1, w2, b2):
    """One-time parameter prep (hoisted out of the per-call forward).

    w1: [784, 128], b1: [1, 128] or [128], w2: [128, 10], b2: [1, 10] or [10]
    Returns kernel-ready (bf16 weights, f32 biases, output lane-padded to 128).
    """
    w1_k = w1.astype(jnp.bfloat16)                               # [784, 128]
    b1_k = b1.reshape(1, HIDDEN).astype(jnp.float32)             # [1, 128]

    w2_k = jnp.zeros((HIDDEN, N_PAD), jnp.bfloat16)
    w2_k = w2_k.at[:, :OUT_FEATURES].set(w2.astype(jnp.bfloat16))
    b2_k = jnp.zeros((1, N_PAD), jnp.float32)
    b2_k = b2_k.at[:, :OUT_FEATURES].set(b2.reshape(1, OUT_FEATURES).astype(jnp.float32))
    return w1_k, b1_k, w2_k, b2_k


def neural_net_forward(x_nchw, params):
    """x_nchw: [B, 1, 28, 28] float32; params from prepare_params.

    Returns logits [B, 10] float32 (both matmuls + ReLU fused in one kernel).
    """
    w1_k, b1_k, w2_k, b2_k = params
    B = x_nchw.shape[0]

    # glue: flatten(start_dim=1); feed f32 directly, cast in-kernel.
    x2d = x_nchw.reshape(B, -1).astype(jnp.float32)              # [B, 784]
    assert x2d.shape[1] == IN_FEATURES

    tile_b = _choose_tile_b(B)
    grid = (pl.cdiv(B, tile_b),)                                 # partial last block is masked

    out_padded = pl.pallas_call(
        _mlp_kernel,
        out_shape=jax.ShapeDtypeStruct((B, N_PAD), jnp.bfloat16),
        grid=grid,
        in_specs=[
            pl.BlockSpec((tile_b, IN_FEATURES), lambda i: (i, 0)),   # x: tiled over batch
            pl.BlockSpec((IN_FEATURES, HIDDEN), lambda i: (0, 0)),   # w1: resident
            pl.BlockSpec((1, HIDDEN), lambda i: (0, 0)),             # b1: resident
            pl.BlockSpec((HIDDEN, N_PAD), lambda i: (0, 0)),         # w2: resident
            pl.BlockSpec((1, N_PAD), lambda i: (0, 0)),              # b2: resident
        ],
        out_specs=pl.BlockSpec((tile_b, N_PAD), lambda i: (i, 0)),
        compiler_params=pltpu.CompilerParams(
            dimension_semantics=("parallel",),   # batch axis -> megacore on v7x
            vmem_limit_bytes=32 << 20,           # > v5e's 16 MiB scoped default; safe on v7x
        ),
    )(x2d, w1_k, b1_k, w2_k, b2_k)

    # Drop the 118 zero logit columns; cast tiny result back to f32 for parity.
    return out_padded[:, :OUT_FEATURES].astype(jnp.float32)


def init_params(key):
    """Deterministic init mimicking torch.nn.Linear default (U[-1/sqrt(fan_in), +])."""
    k1, k2, k3, k4 = jax.random.split(key, 4)
    bound1 = 1.0 / jnp.sqrt(jnp.float32(IN_FEATURES))
    bound2 = 1.0 / jnp.sqrt(jnp.float32(HIDDEN))
    # Stored as [in, out] (transpose of torch's [out, in]) so the kernel does x @ W.
    w1 = jax.random.uniform(k1, (IN_FEATURES, HIDDEN), jnp.float32, -bound1, bound1)
    b1 = jax.random.uniform(k2, (1, HIDDEN), jnp.float32, -bound1, bound1)
    w2 = jax.random.uniform(k3, (HIDDEN, OUT_FEATURES), jnp.float32, -bound2, bound2)
    b2 = jax.random.uniform(k4, (1, OUT_FEATURES), jnp.float32, -bound2, bound2)
    return w1, b1, w2, b2


if __name__ == "__main__":
    key = jax.random.PRNGKey(0)
    k_x, k_p = jax.random.split(key)

    B = 8  # MNIST-shaped input [B, 1, 28, 28]
    x = jax.random.normal(k_x, (B, 1, 28, 28), jnp.float32)
    w1, b1, w2, b2 = init_params(k_p)

    params = prepare_params(w1, b1, w2, b2)      # one-time prep, not per forward call
    logits = neural_net_forward(x, params)
    logits = jax.block_until_ready(logits)

    # sanity check vs. pure-JAX f32 reference (loosened tolerance: bf16 operands
    # for x / h / output rounding; deliberate and fine for inference)
    ref = jnp.maximum(x.reshape(B, -1) @ w1 + b1, 0.0) @ w2 + b2
    assert logits.shape == (B, OUT_FEATURES)
    assert jnp.allclose(logits, ref, atol=3e-2, rtol=3e-2), (
        f"max abs diff = {jnp.max(jnp.abs(logits - ref))}")

    print("KERNEL_OK")
</pallas_src>

<mosaic_0001>
module attributes {stable_mosaic.version = 11 : i64} {
  func.func @_mlp_kernel(%arg0: i32, %arg1: memref<16x784xf32, #tpu.memory_space<vmem>>, %arg2: memref<784x128xbf16, #tpu.memory_space<vmem>>, %arg3: memref<1x128xf32, #tpu.memory_space<vmem>>, %arg4: memref<128x128xbf16, #tpu.memory_space<vmem>>, %arg5: memref<1x128xf32, #tpu.memory_space<vmem>>, %arg6: memref<16x128xbf16, #tpu.memory_space<vmem>>) attributes {dimension_semantics = [#tpu.dimension_semantics<parallel>], iteration_bounds = array<i64: 1>, scalar_prefetch = 0 : i64, scratch_operands = 0 : i64, tpu.core_type = #tpu.core_type<tc>, window_params = [{transform_indices = @transform_0, window_bounds = array<i64: 16, 784>}, {pipeline_mode = #tpu.pipeline_mode<synchronous>, transform_indices = @transform_1, window_bounds = array<i64: 784, 128>}, {pipeline_mode = #tpu.pipeline_mode<synchronous>, transform_indices = @transform_2, window_bounds = array<i64: 1, 128>}, {pipeline_mode = #tpu.pipeline_mode<synchronous>, transform_indices = @transform_3, window_bounds = array<i64: 128, 128>}, {pipeline_mode = #tpu.pipeline_mode<synchronous>, transform_indices = @transform_4, window_bounds = array<i64: 1, 128>}, {transform_indices = @transform_5, window_bounds = array<i64: 16, 128>}]} {
    %c0 = arith.constant 0 : index
    %c0_0 = arith.constant 0 : index
    %0 = vector.load %arg1[%c0, %c0_0] : memref<16x784xf32, #tpu.memory_space<vmem>>, vector<16x784xf32>
    %1 = arith.truncf %0 : vector<16x784xf32> to vector<16x784xbf16>
    %c0_1 = arith.constant 0 : index
    %c0_2 = arith.constant 0 : index
    %2 = vector.load %arg2[%c0_1, %c0_2] : memref<784x128xbf16, #tpu.memory_space<vmem>>, vector<784x128xbf16>
    %cst = arith.constant dense<0.000000e+00> : vector<16x128xf32>
    %3 = tpu.matmul %1, %2, %cst {dimension_numbers = #tpu.dot_dimension_numbers<[1], [0], [0], [1], [0, 0, 1, 1], [], []>} : vector<16x784xbf16>, vector<784x128xbf16>, vector<16x128xf32> -> vector<16x128xf32>
    %c0_3 = arith.constant 0 : index
    %c0_4 = arith.constant 0 : index
    %4 = vector.load %arg3[%c0_3, %c0_4] : memref<1x128xf32, #tpu.memory_space<vmem>>, vector<1x128xf32>
    %5 = vector.broadcast %4 : vector<1x128xf32> to vector<16x128xf32>
    %6 = arith.addf %3, %5 : vector<16x128xf32>
    %cst_5 = arith.constant 0.000000e+00 : f32
    %7 = vector.broadcast %cst_5 : f32 to vector<16x128xf32>
    %8 = arith.maximumf %6, %7 : vector<16x128xf32>
    %9 = arith.truncf %8 : vector<16x128xf32> to vector<16x128xbf16>
    %c0_6 = arith.constant 0 : index
    %c0_7 = arith.constant 0 : index
    %10 = vector.load %arg4[%c0_6, %c0_7] : memref<128x128xbf16, #tpu.memory_space<vmem>>, vector<128x128xbf16>
    %cst_8 = arith.constant dense<0.000000e+00> : vector<16x128xf32>
    %11 = tpu.matmul %9, %10, %cst_8 {dimension_numbers = #tpu.dot_dimension_numbers<[1], [0], [0], [1], [0, 0, 1, 1], [], []>} : vector<16x128xbf16>, vector<128x128xbf16>, vector<16x128xf32> -> vector<16x128xf32>
    %c0_9 = arith.constant 0 : index
    %c0_10 = arith.constant 0 : index
    %12 = vector.load %arg5[%c0_9, %c0_10] : memref<1x128xf32, #tpu.memory_space<vmem>>, vector<1x128xf32>
    %13 = vector.broadcast %12 : vector<1x128xf32> to vector<16x128xf32>
    %14 = arith.addf %11, %13 : vector<16x128xf32>
    %15 = arith.truncf %14 : vector<16x128xf32> to vector<16x128xbf16>
    %c0_11 = arith.constant 0 : index
    %c0_12 = arith.constant 0 : index
    %16 = vector.load %arg6[%c0_11, %c0_12] : memref<16x128xbf16, #tpu.memory_space<vmem>>, vector<16x128xbf16>
    tpu.vector_store %arg6[%c0_11, %c0_12], %15 {strides = array<i32>} : memref<16x128xbf16, #tpu.memory_space<vmem>>, vector<16x128xbf16>,
    return
  }
  func.func @transform_0(%arg0: i32) -> (i32, i32) {
    %c0_i32 = arith.constant 0 : i32
    %c0_i32_0 = arith.constant 0 : i32
    return %arg0, %c0_i32 : i32, i32
  }
  func.func @transform_1(%arg0: i32) -> (i32, i32) {
    %c0_i32 = arith.constant 0 : i32
    %c0_i32_0 = arith.constant 0 : i32
    %c0_i32_1 = arith.constant 0 : i32
    return %c0_i32, %c0_i32_0 : i32, i32
  }
  func.func @transform_2(%arg0: i32) -> (i32, i32) {
    %c0_i32 = arith.constant 0 : i32
    %c0_i32_0 = arith.constant 0 : i32
    %c0_i32_1 = arith.constant 0 : i32
    return %c0_i32, %c0_i32_0 : i32, i32
  }
  func.func @transform_3(%arg0: i32) -> (i32, i32) {
    %c0_i32 = arith.constant 0 : i32
    %c0_i32_0 = arith.constant 0 : i32
    %c0_i32_1 = arith.constant 0 : i32
    return %c0_i32, %c0_i32_0 : i32, i32
  }
  func.func @transform_4(%arg0: i32) -> (i32, i32) {
    %c0_i32 = arith.constant 0 : i32
    %c0_i32_0 = arith.constant 0 : i32
    %c0_i32_1 = arith.constant 0 : i32
    return %c0_i32, %c0_i32_0 : i32, i32
  }
  func.func @transform_5(%arg0: i32) -> (i32, i32) {
    %c0_i32 = arith.constant 0 : i32
    %c0_i32_0 = arith.constant 0 : i32
    return %arg0, %c0_i32 : i32, i32
  }
}

</mosaic_0001>

<bundles_post_ra>
// kernel: tpu_custom_call.1
= control target key start
LH: loop header
LB: loop body
LE: loop exit
PB: predicated region body
PF: predicated region fallthrough
CT: control target
= control target key end

     0   :  { %10 = vsyncpa [#allocation3], 0  ;;  %s1199_s0 = inlined_call_operand.hbm [shape: f32[8,784], index: 0, kind: input, shape index: {}]   ;;  %s1200_s1 = inlined_call_operand.hbm [shape: bf16[784,128], index: 1, kind: input, shape index: {}]   ;;  %s1201_s2 = inlined_call_operand.vmem [shape: f32[1,128], index: 2, kind: input, shape index: {}]   ;;  %s1202_s3 = inlined_call_operand.hbm [shape: bf16[128,128], index: 3, kind: input, shape index: {}]   ;;  %s1203_s4 = inlined_call_operand.vmem [shape: f32[1,128], index: 4, kind: input, shape index: {}]   ;;  %s1204_s5 = inlined_call_operand.hbm [shape: bf16[8,128], index: 5, kind: output, shape index: {}]  }
   0x1   :  { %11 = vsyncpa [#allocation6], 0 }
   0x2   :  { %12 = vsyncpa [#allocation4], 0 }
   0x3   :  { %17 = vsyncadd [#allocation3], 896  ;;  %s1119_s18 = smov [#allocation5]  }
   0x4   :  { %s30_s19 = sshll.u32 %s1119_s18, 4  ;;  %s31_s19 = int_to_ptr.vmem [resolvable:$true] %s30_s19 }
   0x5   :  { %s1041_s20 = scalar_lea.vmem %s31_s19, 6272  ;;  %p1046_p1 = scmp.lt.s32.totalorder %s31_s19, %s31_s19 }
   0x6   :  { %p1042_p0 = scmp.ne.s32.totalorder %s31_s19, %s1041_s20  ;;  %p1047_p2 = scmp.lt.s32.totalorder %s1041_s20, %s1041_s20 }
   0x8   :  { %p1048_p3 = por %p1047_p2, %p1046_p1 }
   0xa   :  { %p1049_p4 = pnand %p1048_p3, %p1042_p0 }
   0xc   :  { %1052 = shalt.err (!%p1049_p4)
}
   0xd   :  { %s1120_s21 = smov 64   ;;  %s1121_s22 = smov 4  }
   0xe   :  { %36 = dma.hbm_to_vmem [thread:$0]  %s1200_s1, 6272, %s31_s19, [#allocation6], %s1120_s21, %s1120_s21, %s1121_s22  }
   0xf   :  { %s1122_s25 = smov [#allocation2]  }
  0x10   :  { %s18_s26 = sshll.u32 %s1122_s25, 4  ;;  %s19_s26 = int_to_ptr.vmem [resolvable:$true] %s18_s26 }
  0x11   :  { %s1061_s27 = scalar_lea.vmem %s19_s26, 896  ;;  %s1065_s28 = scalar_lea.vmem %s19_s26, 1792 }
  0x12   :  { %p1062_p5 = scmp.ne.s32.totalorder %s19_s26, %s1061_s27  ;;  %p1066_p6 = scmp.lt.s32.totalorder %s19_s26, %s19_s26 }
  0x13   :  { %p1067_p7 = scmp.lt.s32.totalorder %s1065_s28, %s1061_s27 }
  0x15   :  { %p1068_p8 = por %p1067_p7, %p1066_p6 }
  0x17   :  { %p1069_p9 = pnand %p1068_p8, %p1062_p5 }
  0x19   :  { %1072 = shalt.err (!%p1069_p9)
}
  0x1a   :  { %s1123_s29 = smov 896   ;;  %s1124_s30 = smov 56  }
  0x1b   :  { %24 = dma.hbm_to_vmem [thread:$0]  %s1199_s0, 896, %s19_s26, [#allocation3], %s1123_s29, %s1123_s29, %s1124_s30  }
  0x1c   :  { %s1125_s8 = smov [#allocation7]  }
  0x1d   :  { %s44_s9 = sshll.u32 %s1125_s8, 4  ;;  %s45_s9 = int_to_ptr.vmem [resolvable:$true] %s44_s9 }
  0x1e   :  { %s1081_s1 = scalar_lea.vmem %s45_s9, 1024  ;;  %p1086_p11 = scmp.lt.s32.totalorder %s45_s9, %s45_s9 }
  0x1f   :  { %p1082_p10 = scmp.ne.s32.totalorder %s45_s9, %s1081_s1  ;;  %p1087_p12 = scmp.lt.s32.totalorder %s1081_s1, %s1081_s1 }
  0x21   :  { %p1088_p13 = por %p1087_p12, %p1086_p11 }
  0x23   :  { %p1089_p0 = pnand %p1088_p13, %p1082_p10 }
  0x25   :  { %1092 = shalt.err (!%p1089_p0)
}
  0x26   :  { %50 = dma.hbm_to_vmem [thread:$0]  %s1202_s3, 1024, %s45_s9, [#allocation6], %s1120_s21, %s1120_s21, %s1121_s22  }
  0x27   :  { %1113 = dma.done.wait [#allocation3], 1792  }
  0x28   :  { %1114 = vsyncadd [#allocation3], 4294965504 }
  0x29   :  { %1115 = dma.done.wait [#allocation6], 7296  }
  0x2a   :  { %1116 = vsyncadd [#allocation6], 4294960000  ;;  %v976_v0 = vld [vmem:[#allocation5 + $0x78] sm:$0xff]   ;;  %v980_v4 = vld [vmem:[#allocation5 + $0x70] sm:$0xff]   ;;  %v1126_v43 = vmov 0.0   ;;  %vm1127_vm0 = vmmov 0  }
  0x2b   :  { %v977_v1 = vld [vmem:[#allocation5 + $0x38] sm:$0xff]   ;;  %863 = vmatprep.subr.bf16.mxu0 %v976_v0  ;;  %v981_v5 = vld [vmem:[#allocation5 + $0x30] sm:$0xff]   ;;  %v984_v8 = vld [vmem:[#allocation5 + $0x68] sm:$0xff]   ;;  %vm483_vm1 = vcmask 130048  }
  0x2c   :  { %v978_v2 = vld [vmem:[#allocation5 + $0xf8] sm:$0xff]   ;;  %864 = vmatpush3.bf16.msra.mxu0 %v977_v1  ;;  %v982_v6 = vld [vmem:[#allocation5 + $0xf0] sm:$0xff]   ;;  %v985_v9 = vld [vmem:[#allocation5 + $0x28] sm:$0xff]  }
  0x2d   :  { %v979_v3 = vld [vmem:[#allocation5 + $0xb8] sm:$0xff]   ;;  %885 = vmatprep.subr.bf16.mxu1 %v978_v2  ;;  %865 = vmatprep.subr.bf16.mxu0 %v980_v4  ;;  %v983_v7 = vld [vmem:[#allocation5 + $0xb0] sm:$0xff]   ;;  %v986_v10 = vld [vmem:[#allocation5 + $0xe8] sm:$0xff]  }
  0x2e   :  { %886 = vmatpush3.bf16.msra.mxu1 %v979_v3  ;;  %v987_v11 = vld [vmem:[#allocation5 + $0xa8] sm:$0xff]   ;;  %v988_v12 = vld [vmem:[#allocation5 + $0x60] sm:$0xff]   ;;  %v992_v16 = vld [vmem:[#allocation5 + $0x58] sm:$0xff]  }
  0x2f   :  { %887 = vmatprep.subr.bf16.mxu1 %v982_v6  ;;  %v989_v13 = vld [vmem:[#allocation5 + $0x20] sm:$0xff]   ;;  %v993_v17 = vld [vmem:[#allocation5 + $0x18] sm:$0xff]   ;;  %v996_v20 = vld [vmem:[#allocation5 + $0x50] sm:$0xff]  }
  0x30   :  { %866 = vmatpush3.bf16.msra.mxu0 %v981_v5  ;;  %v990_v14 = vld [vmem:[#allocation5 + $0xe0] sm:$0xff]   ;;  %v994_v18 = vld [vmem:[#allocation5 + $0xd8] sm:$0xff]   ;;  %v997_v21 = vld [vmem:[#allocation5 + $0x10] sm:$0xff]  }
  0x31   :  { %867 = vmatprep.subr.bf16.mxu0 %v984_v8  ;;  %v991_v15 = vld [vmem:[#allocation5 + $0xa0] sm:$0xff]   ;;  %v995_v19 = vld [vmem:[#allocation5 + $0x98] sm:$0xff]   ;;  %v998_v22 = vld [vmem:[#allocation5 + $0xd0] sm:$0xff]  }
  0x32   :  { %888 = vmatpush3.bf16.msra.mxu1 %v983_v7  ;;  %v999_v23 = vld [vmem:[#allocation5 + $0x90] sm:$0xff]   ;;  %v1000_v24 = vld [vmem:[#allocation5 + $0x48] sm:$0xff]   ;;  %v1004_v28 = vld [vmem:[#allocation5 + $0x40] sm:$0xff]  }
  0x33   :  { %889 = vmatprep.subr.bf16.mxu1 %v986_v10  ;;  %v1001_v25 = vld [vmem:[#allocation5 + $0x8] sm:$0xff]   ;;  %v1005_v29 = vld [vmem:[#allocation5] sm:$0xff]   ;;  %v64_v31 = vld [vmem:[#allocation2 + $0x8] sm:$0xff] }
  0x34   :  { %868 = vmatpush3.bf16.msra.mxu0 %v985_v9  ;;  %v1002_v26 = vld [vmem:[#allocation5 + $0xc8] sm:$0xff]   ;;  %v1006_v30 = vld [vmem:[#allocation5 + $0xc0] sm:$0xff]   ;;  %v71_v32 = vld [vmem:[#allocation2 + $0x40] sm:$0xff] }
  0x35   :  { %869 = vmatprep.subr.bf16.mxu0 %v988_v12  ;;  %v1003_v27 = vld [vmem:[#allocation5 + $0x88] sm:$0xff]   ;;  %v78_v33 = vpack.c.bf16 %v71_v32, %v64_v31  ;;  %v1007_v34 = vld [vmem:[#allocation5 + $0x80] sm:$0xff]   ;;  %v63_v35 = vld [vmem:[#allocation2] sm:$0xff] }
  0x36   :  { %890 = vmatpush3.bf16.msra.mxu1 %v987_v11  ;;  %v70_v36 = vld [vmem:[#allocation2 + $0x38] sm:$0xff]  ;;  %v1008_v38 = vld [vmem:[#allocation5 + $0x178] sm:$0xff]   ;;  %v73_v40 = vld [vmem:[#allocation2 + $0x50] sm:$0xff] }
  0x37   :  { %891 = vmatprep.subr.bf16.mxu1 %v990_v14  ;;  %519 = vmatprep.mubr.bf16.mxu0 %v78_v33  ;;  %v77_v37 = vpack.c.bf16 %v70_v36, %v63_v35  ;;  %v66_v39 = vld [vmem:[#allocation2 + $0x18] sm:$0xff]  ;;  %v1009_v42 = vld [vmem:[#allocation5 + $0x138] sm:$0xff]   ;;  %v65_v44 = vld [vmem:[#allocation2 + $0x10] sm:$0xff] }
  0x38   :  { %870 = vmatpush3.bf16.msra.mxu0 %v989_v13  ;;  %v80_v41 = vpack.c.bf16 %v73_v40, %v66_v39  ;;  %v72_v45 = vld [vmem:[#allocation2 + $0x48] sm:$0xff]  ;;  %v1010_v47 = vld [vmem:[#allocation5 + $0x170] sm:$0xff]   ;;  %v1012_v49 = vld [vmem:[#allocation5 + $0x168] sm:$0xff]  }
  0x39   :  { %871 = vmatprep.subr.bf16.mxu0 %v992_v16  ;;  %v79_v46 = vpack.c.bf16 %v72_v45, %v65_v44  ;;  %v1011_v48 = vld [vmem:[#allocation5 + $0x130] sm:$0xff]   ;;  %v1013_v50 = vld [vmem:[#allocation5 + $0x128] sm:$0xff]   ;;  %v1014_v51 = vld [vmem:[#allocation5 + $0x160] sm:$0xff]  }
  0x3a   :  { %892 = vmatpush3.bf16.msra.mxu1 %v991_v15  ;;  %560 = vmatprep.mubr.bf16.mxu1 %v80_v41  ;;  %v1015_v52 = vld [vmem:[#allocation5 + $0x120] sm:$0xff]   ;;  %v1016_v53 = vld [vmem:[#allocation5 + $0x158] sm:$0xff]   ;;  %v1018_v55 = vld [vmem:[#allocation5 + $0x150] sm:$0xff]  }
  0x3b   :  { %893 = vmatprep.subr.bf16.mxu1 %v994_v18  ;;  %v1017_v54 = vld [vmem:[#allocation5 + $0x118] sm:$0xff]   ;;  %v1024_v56 = vld [vmem:[#allocation5 + $0x180] sm:$0xff]   ;;  %v1019_v58 = vld [vmem:[#allocation5 + $0x110] sm:$0xff]  }
  0x3c   :  { %872 = vmatpush3.bf16.msra.mxu0 %v993_v17  ;;  %v68_v57 = vld [vmem:[#allocation2 + $0x28] sm:$0xff]  ;;  %v1020_v59 = vld [vmem:[#allocation5 + $0x148] sm:$0xff]   ;;  %v75_v60 = vld [vmem:[#allocation2 + $0x60] sm:$0xff] }
  0x3d   :  { %873 = vmatprep.subr.bf16.mxu0 %v996_v20  ;;  %v82_v61 = vpack.c.bf16 %v75_v60, %v68_v57  ;;  %v69_v62 = vld [vmem:[#allocation2 + $0x30] sm:$0xff]  ;;  %v76_v63 = vld [vmem:[#allocation2 + $0x68] sm:$0xff]  ;;  %v1021_v1 = vld [vmem:[#allocation5 + $0x108] sm:$0xff]  }
  0x3e   :  { %894 = vmatpush3.bf16.msra.mxu1 %v995_v19  ;;  %v83_v0 = vpack.c.bf16 %v76_v63, %v69_v62  ;;  %v1022_v2 = vld [vmem:[#allocation5 + $0x140] sm:$0xff]   ;;  %v67_v4 = vld [vmem:[#allocation2 + $0x20] sm:$0xff]  ;;  %v74_v5 = vld [vmem:[#allocation2 + $0x58] sm:$0xff] }
  0x3f   :  { %895 = vmatprep.subr.bf16.mxu1 %v998_v22  ;;  %v1023_v3 = vld [vmem:[#allocation5 + $0x100] sm:$0xff]   ;;  %v81_v6 = vpack.c.bf16 %v74_v5, %v67_v4  ;;  %v1026_v8 = vld [vmem:[#allocation7 + $0x30] sm:$0xff]   ;;  %v1027_v9 = vld [vmem:[#allocation7 + $0x28] sm:$0xff]  }
  0x40   :  { %874 = vmatpush3.bf16.msra.mxu0 %v997_v21  ;;  %v1025_v7 = vld [vmem:[#allocation7 + $0x38] sm:$0xff]   ;;  %v1028_v10 = vld [vmem:[#allocation7 + $0x20] sm:$0xff]   ;;  %v1030_v12 = vld [vmem:[#allocation7 + $0x10] sm:$0xff]  }
  0x41   :  { %875 = vmatprep.subr.bf16.mxu0 %v1000_v24  ;;  %v1029_v11 = vld [vmem:[#allocation7 + $0x18] sm:$0xff]   ;;  %v1031_v13 = vld [vmem:[#allocation7 + $0x8] sm:$0xff]   ;;  %v1032_v14 = vld [vmem:[#allocation7] sm:$0xff]  }
  0x42   :  { %896 = vmatpush3.bf16.msra.mxu1 %v999_v23 }
  0x43   :  { %897 = vmatprep.subr.bf16.mxu1 %v1002_v26 }
  0x44   :  { %876 = vmatpush3.bf16.msra.mxu0 %v1001_v25 }
  0x45   :  { %877 = vmatprep.subr.bf16.mxu0 %v1004_v28 }
  0x46   :  { %898 = vmatpush3.bf16.msra.mxu1 %v1003_v27  ;;  %v794_v27 = vld [vmem:[%s1201_s2] ss:$0 sm:$0xff] }
  0x47   :  { %899 = vmatprep.subr.bf16.mxu1 %v1006_v30 }
  0x48   :  { %878 = vmatpush3.bf16.msra.mxu0 %v1005_v29 }
  0x49   :  { %907 = vmatprep.subr.bf16.mxu0 %v1008_v38 }
  0x4a   :  { %900 = vmatpush3.bf16.msra.mxu1 %v1007_v34 }
  0x4b   :  { %940 = vmatprep.subr.bf16.mxu1 %v1126_v43  ;;  %520 = vmatmul.mubr.bf16.vlgmr.msra.gmra.mxu0 %v77_v37 }
  0x4c   :  { %908 = vmatpush3.bf16.msra.mxu0 %v1009_v42  ;;  %601 = vmatprep.mubr.bf16.mxu0 %v82_v61 }
  0x4d   :  { %561 = vmatmul.mubr.bf16.vlgmr.msra.gmra.mxu1 %v79_v46  ;;  %909 = vmatprep.subr.bf16.mxu0 %v1010_v47 }
  0x4e   :  { %942 = vmatprep.mubr.msk.bf16.mxu1 %vm1127_vm0, %v1126_v43  ;;  %941 = vmatpush3.bf16.msra.mxu1 %v1024_v56 }
  0x4f   :  { %946 = vmatprep.subr.bf16.mxu1 %v1126_v43 }
  0x50   :  { %910 = vmatpush3.bf16.msra.mxu0 %v1011_v48 }
  0x51   :  { %911 = vmatprep.subr.bf16.mxu0 %v1012_v49 }
  0x54   :  { %912 = vmatpush3.bf16.msra.mxu0 %v1013_v50  ;;  %v845_v50 = vld [vmem:[%s1203_s4] ss:$0 sm:$0xff] }
  0x55   :  { %913 = vmatprep.subr.bf16.mxu0 %v1014_v51  ;;  %943 = vmatmul.mubr.msk.bf16.vlgmr.msra.gmra.mxu1 %vm483_vm1, %v83_v0 }
  0x56   :  { %962 = vmatprep.mubr.msk.bf16.mxu1 %vm1127_vm0, %v1126_v43  ;;  %947 = vmatpush3.bf16.msra.mxu1 %v1025_v7 }
  0x57   :  { %948 = vmatprep.subr.bf16.mxu1 %v1126_v43 }
  0x58   :  { %914 = vmatpush3.bf16.msra.mxu0 %v1015_v52 }
  0x59   :  { %915 = vmatprep.subr.bf16.mxu0 %v1016_v53 }
  0x5a   :  { %949 = vmatpush3.bf16.msra.mxu1 %v1026_v8 }
  0x5b   :  { %950 = vmatprep.subr.bf16.mxu1 %v1126_v43 }
  0x5c   :  { %916 = vmatpush3.bf16.msra.mxu0 %v1017_v54 }
  0x5d   :  { %917 = vmatprep.subr.bf16.mxu0 %v1018_v55 }
  0x5e   :  { %951 = vmatpush3.bf16.msra.mxu1 %v1027_v9 }
  0x5f   :  { %952 = vmatprep.subr.bf16.mxu1 %v1126_v43 }
  0x60   :  { %918 = vmatpush3.bf16.msra.mxu0 %v1019_v58 }
  0x61   :  { %919 = vmatprep.subr.bf16.mxu0 %v1020_v59 }
  0x62   :  { %953 = vmatpush3.bf16.msra.mxu1 %v1028_v10 }
  0x63   :  { %954 = vmatprep.subr.bf16.mxu1 %v1126_v43 }
  0x64   :  { %920 = vmatpush3.bf16.msra.mxu0 %v1021_v1 }
  0x65   :  { %921 = vmatprep.subr.bf16.mxu0 %v1022_v2 }
  0x66   :  { %955 = vmatpush3.bf16.msra.mxu1 %v1029_v11 }
  0x67   :  { %956 = vmatprep.subr.bf16.mxu1 %v1126_v43 }
  0x68   :  { %922 = vmatpush3.bf16.msra.mxu0 %v1023_v3 }
  0x6a   :  { %957 = vmatpush3.bf16.msra.mxu1 %v1030_v12 }
  0x6b   :  { %602 = vmatmul.mubr.bf16.vlgmr.msra.gmra.mxu0 %v81_v6  ;;  %958 = vmatprep.subr.bf16.mxu1 %v1126_v43 }
  0x6e   :  { %959 = vmatpush3.bf16.msra.mxu1 %v1031_v13 }
  0x6f   :  { %960 = vmatprep.subr.bf16.mxu1 %v1126_v43 }
  0x72   :  { %961 = vmatpush3.bf16.msra.mxu1 %v1032_v14 }
 0x10b   :  { %v879_v18 = vpop.f32.mrf.mxu0 }
 0x10d   :  { %v901_v15 = vpop.f32.mrf.mxu1  ;;  %v880_v20 = vpop.f32.mrf.mxu0 }
 0x10e   :  { %v881_v26 = vadd.f32 %v880_v20, %v879_v18 }
 0x10f   :  { %v902_v16 = vpop.f32.mrf.mxu1  ;;  %v882_v23 = vpop.f32.mrf.mxu0 }
 0x110   :  { %v522_v29 = vadd.f32 %v881_v26, %v794_v27  ;;  %v903_v30 = vadd.f32 %v902_v16, %v901_v15 }
 0x111   :  { %v904_v17 = vpop.f32.mrf.mxu1  ;;  %v883_v28 = vpop.f32.mrf.mxu0 }
 0x112   :  { %v884_v31 = vadd.f32 %v883_v28, %v882_v23  ;;  %v563_v34 = vadd.f32 %v903_v30, %v522_v29 }
 0x113   :  { %v905_v19 = vpop.f32.mrf.mxu1 }
 0x114   :  { %v525_v35 = vadd.f32 %v884_v31, %v794_v27  ;;  %v906_v36 = vadd.f32 %v905_v19, %v904_v17 }
 0x115   :  { %v644_v21 = vpop.f32.mrf.mxu1 }
 0x116   :  { %v566_v41 = vadd.f32 %v906_v36, %v525_v35 }
 0x117   :  { %v944_v22 = vpop.f32.mrf.mxu1 }
 0x119   :  { %v647_v24 = vpop.f32.mrf.mxu1 }
 0x11b   :  { %v945_v25 = vpop.f32.mrf.mxu1 }
 0x12b   :  { %v923_v32 = vpop.f32.mrf.mxu0 }
 0x12d   :  { %v924_v33 = vpop.f32.mrf.mxu0 }
 0x12e   :  { %v925_v37 = vadd.f32 %v924_v33, %v923_v32 }
 0x12f   :  { %v926_v38 = vpop.f32.mrf.mxu0 }
 0x130   :  { %v604_v39 = vadd.f32 %v925_v37, %v563_v34 }
 0x131   :  { %v927_v40 = vpop.f32.mrf.mxu0 }
 0x132   :  { %v928_v42 = vadd.f32 %v927_v40, %v926_v38  ;;  %v645_v43 = vadd.f32 %v644_v21, %v604_v39 }
 0x134   :  { %v607_v44 = vadd.f32 %v928_v42, %v566_v41  ;;  %v651_v46 = vmax.f32 %v645_v43, 0.0 }
 0x136   :  { %v648_v45 = vadd.f32 %v647_v24, %v607_v44 }
 0x138   :  { %v652_v47 = vmax.f32 %v648_v45, 0.0 }
 0x13a   :  { %v653_v48 = vpack.c.bf16 %v652_v47, %v651_v46 }
 0x13c   :  { %963 = vmatmul.mubr.bf16.vlgmr.msra.gmra.mxu1 %v653_v48 }
 0x1fc   :  { %v759_v49 = vpop.f32.mrf.mxu1 }
 0x1fd   :  { %v760_v53 = vadd.f32 %v845_v50, %v759_v49 }
 0x1fe   :  { %v964_v51 = vpop.f32.mrf.mxu1 }
 0x200   :  { %v762_v52 = vpop.f32.mrf.mxu1 }
 0x201   :  { %v763_v54 = vadd.f32 %v845_v50, %v762_v52 }
 0x202   :  { %v965_v55 = vpop.f32.mrf.mxu1 }
 0x203   :  { %v861_v56 = vpack.c.bf16 %v763_v54, %v760_v53 }
 0x205   :  { %862 = vst [vmem:[#allocation8] sm:$0xff] %v861_v56  }
 0x206   :  { %780 = vsyncadd [#allocation4], 64  ;;  %s1128_s13 = smov [#allocation8]  }
 0x207   :  { %s781_s14 = sshll.u32 %s1128_s13, 4  ;;  %s782_s14 = int_to_ptr.vmem [resolvable:$true] %s781_s14 }
 0x208   :  { %s1093_s15 = scalar_lea.vmem %s782_s14, 64  ;;  %s1097_s16 = scalar_lea.vmem %s782_s14, 128 }
 0x209   :  { %p1094_p1 = scmp.ne.s32.totalorder %s782_s14, %s1093_s15  ;;  %p1098_p2 = scmp.lt.s32.totalorder %s782_s14, %s782_s14 }
 0x20a   :  { %p1099_p3 = scmp.lt.s32.totalorder %s1097_s16, %s1093_s15 }
 0x20c   :  { %p1100_p4 = por %p1099_p3, %p1098_p2 }
 0x20e   :  { %p1101_p5 = pnand %p1100_p4, %p1094_p1 }
 0x210   :  { %1104 = shalt.err (!%p1101_p5)
}
 0x211   :  { %787 = dma.vmem_to_hbm [thread:$0]  %s782_s14, 64, %s1204_s5, [#allocation4], %s1120_s21, %s1120_s21, %s1121_s22  }
 0x212   :  { %1117 = dma.done.wait [#allocation4], 128  }
 0x213   :  { %1118 = vsyncadd [#allocation4], 4294967168 }
 0x214   :  { %791 = vsyncpa [#allocation3], 1 }
 0x215   :  { %792 = vsyncpa [#allocation6], 1 }
 0x216   :  { %793 = vsyncpa [#allocation4], 1 }

</bundles_post_ra>
